<compile_context>
chip_gen: v6e
topology: v6e:2x2x1
jax: 0.10.0
libtpu: 0.0.40
codegen_flags: <defaults>
</compile_context>

<pallas_src>
import functools

import jax
import jax.numpy as jnp
from jax.experimental import pallas as pl
from jax.experimental.pallas import tpu as pltpu


# ------------------------- distiller-style quant helpers ----------------------

def get_quantized_range(num_bits, signed=True):
    if signed:
        n = 2 ** (num_bits - 1)
        return float(-n), float(n - 1)
    return 0.0, float(2 ** num_bits - 1)


def symmetric_linear_quantization_params(num_bits, sat_val):
    # distiller: leave one bit for sign, n = 2^(num_bits-1) - 1, zp = 0
    n = float(2 ** (num_bits - 1) - 1)
    sat_val = max(float(sat_val), 1e-8)
    return n / sat_val, 0.0


def quant_params_from_stats(stats, num_bits):
    # SYMMETRIC mode, ClipMode.NONE branch of _get_quant_params_from_stats_dict
    sat = max(abs(float(stats['min'])), abs(float(stats['max'])))
    return symmetric_linear_quantization_params(num_bits, sat)


def linear_quantize_clamp(x, scale, zp, qmin, qmax):
    return jnp.clip(jnp.round(scale * x - zp), qmin, qmax)


def _round_up(x, m):
    return (x + m - 1) // m * m


# ----------------------- init-time parameter quantization ---------------------

def quantize_linear_params(weight, bias, *, num_bits_acts=8, num_bits_params=8,
                           num_bits_accum=32, in_stats=None):
    """Done ONCE at wrapper __init__ time (not in the per-call hot path).

    Returns (w_q_t, b_q, w_scale) where w_q_t is the quantized weight,
    pre-transposed to (In, Out) and stored in bf16 (int8-range integers are
    bit-exact in bf16), and b_q is the f32 quantized bias (1, Out).
    """
    # bf16 exactness guard (values must stay integers with |v| < 2^8)
    assert num_bits_acts <= 8 and num_bits_params <= 8, \
        "bf16 MXU path is only bit-exact for <=8-bit activation/param quantization"

    params_min, params_max = get_quantized_range(num_bits_params, signed=True)
    accum_min, accum_max = get_quantized_range(num_bits_accum, signed=True)
    in_scale, _ = quant_params_from_stats(in_stats, num_bits_acts)

    w_sat = float(jnp.max(jnp.abs(weight)))      # host sync is fine: init-time only
    w_scale, _ = symmetric_linear_quantization_params(num_bits_params, w_sat)

    w_q = linear_quantize_clamp(weight, w_scale, 0.0, params_min, params_max)
    w_q_t = jnp.transpose(w_q).astype(jnp.bfloat16)          # (In, Out), bf16

    b_q = linear_quantize_clamp(bias, in_scale * w_scale, 0.0, accum_min, accum_max)
    b_q = b_q.reshape(1, -1).astype(jnp.float32)             # (1, Out), f32

    return w_q_t, b_q, float(w_scale)


# --------------------------------- the kernel --------------------------------

def _rlq_linear_kernel(x_ref, wt_ref, b_ref, out_ref, acc_ref, *,
                       in_scale, in_zp, requant_scale, out_zp, inv_out_scale,
                       acts_min, acts_max, accum_min, accum_max):
    """One (tm, tn) output tile, accumulated over the k (reduction) grid axis.

    All qparams are Python floats baked in at trace time (symmetric mode =>
    in_zp == out_zp == 0, so those terms vanish).
    """
    k = pl.program_id(2)

    @pl.when(k == 0)
    def _init():
        acc_ref[...] = jnp.zeros_like(acc_ref)

    # linear_quantize_clamp(input, in_scale, in_zp, acts_min, acts_max)  (VPU)
    x = x_ref[...].astype(jnp.float32)
    x_aff = in_scale * x - in_zp if in_zp != 0.0 else in_scale * x
    x_q = jnp.clip(jnp.round(x_aff), acts_min, acts_max)

    # integer matmul on the MXU: int8-range integers are exact in bf16, f32 accum.
    # (exact vs an int32 accumulator while In * 127 * 127 < 2**24)
    acc_ref[...] += jnp.dot(x_q.astype(jnp.bfloat16), wt_ref[...],
                            preferred_element_type=jnp.float32)

    @pl.when(k == pl.num_programs(2) - 1)
    def _finalize():
        accum = acc_ref[...] + b_ref[...]
        accum = jnp.clip(accum, accum_min, accum_max)
        # linear_quantize_clamp(accum, requant_scale, out_zp, acts_min, acts_max)
        out_aff = (requant_scale * accum - out_zp) if out_zp != 0.0 \
            else requant_scale * accum
        out_q = jnp.clip(jnp.round(out_aff), acts_min, acts_max)
        # linear_dequantize(out_q, out_scale, out_zp) — divide replaced by multiply
        deq = (out_q + out_zp) if out_zp != 0.0 else out_q
        out_ref[...] = (deq * inv_out_scale).astype(out_ref.dtype)


# --------------------------------- the wrapper --------------------------------

def range_linear_quant_linear(x, w_q_t, b_q, *, w_scale, num_bits_acts=8,
                              num_bits_accum=32, in_stats, out_stats,
                              tm=128, tn=256, tk=512):
    """Forward pass with pre-quantized (init-time) parameters."""
    B, In = x.shape
    In_w, Out = w_q_t.shape
    assert In == In_w and b_q.shape == (1, Out)

    acts_min, acts_max = get_quantized_range(num_bits_acts, signed=True)    # SYMMETRIC => signed
    accum_min, accum_max = get_quantized_range(num_bits_accum, signed=True)
    in_scale, in_zp = quant_params_from_stats(in_stats, num_bits_acts)
    out_scale, out_zp = quant_params_from_stats(out_stats, num_bits_acts)
    requant_scale = out_scale / (in_scale * w_scale)

    # Adapt tiles for small shapes, keep N/K lane-dense (multiples of 128) when big.
    tm = min(tm, _round_up(B, 8))
    tk = min(tk, _round_up(In, 128))
    tn = min(tn, _round_up(Out, 128))
    B_p, In_p, Out_p = _round_up(B, tm), _round_up(In, tk), _round_up(Out, tn)

    # Zero padding is semantics-preserving: padded x quantizes to 0 and padded
    # weight/bias entries are 0, so real output entries are unchanged.
    # Only emit the pad ops when actually needed (avoids extra HBM copies).
    x_p = x.astype(jnp.float32)
    if (B_p, In_p) != (B, In):
        x_p = jnp.pad(x_p, ((0, B_p - B), (0, In_p - In)))
    w_p = w_q_t
    if (In_p, Out_p) != (In, Out):
        w_p = jnp.pad(w_p, ((0, In_p - In), (0, Out_p - Out)))
    b_p = b_q
    if Out_p != Out:
        b_p = jnp.pad(b_p, ((0, 0), (0, Out_p - Out)))

    kernel = functools.partial(
        _rlq_linear_kernel,
        in_scale=float(in_scale), in_zp=float(in_zp),
        requant_scale=float(requant_scale), out_zp=float(out_zp),
        inv_out_scale=float(1.0 / out_scale),
        acts_min=acts_min, acts_max=acts_max,
        accum_min=accum_min, accum_max=accum_max)

    grid = (B_p // tm, Out_p // tn, In_p // tk)

    out = pl.pallas_call(
        kernel,
        out_shape=jax.ShapeDtypeStruct((B_p, Out_p), jnp.float32),
        grid_spec=pltpu.PrefetchScalarGridSpec(
            num_scalar_prefetch=0,
            grid=grid,
            in_specs=[
                pl.BlockSpec((tm, tk), lambda i, j, k: (i, k)),   # x (f32)
                pl.BlockSpec((tk, tn), lambda i, j, k: (k, j)),   # W^T, pre-transposed, bf16
                pl.BlockSpec((1, tn), lambda i, j, k: (0, j)),    # quantized bias (f32)
            ],
            out_specs=pl.BlockSpec((tm, tn), lambda i, j, k: (i, j)),
            scratch_shapes=[pltpu.VMEM((tm, tn), jnp.float32)],
        ),
        compiler_params=pltpu.CompilerParams(
            dimension_semantics=("parallel", "parallel", "arbitrary")),
        cost_estimate=pl.CostEstimate(
            flops=2 * B_p * In_p * Out_p,
            transcendentals=0,
            bytes_accessed=(B_p * In_p * 4 + In_p * Out_p * 2 + Out_p * 4
                            + B_p * Out_p * 4)),
    )(x_p, w_p, b_p)

    if (B_p, Out_p) != (B, Out):
        out = out[:B, :Out]
    return out


# ------------------------------ reference (JAX) -------------------------------

def _reference(x, weight, bias, in_stats, out_stats,
               num_bits_acts=8, num_bits_params=8, num_bits_accum=32):
    acts_min, acts_max = get_quantized_range(num_bits_acts, True)
    params_min, params_max = get_quantized_range(num_bits_params, True)
    accum_min, accum_max = get_quantized_range(num_bits_accum, True)
    in_scale, in_zp = quant_params_from_stats(in_stats, num_bits_acts)
    out_scale, out_zp = quant_params_from_stats(out_stats, num_bits_acts)
    w_sat = float(jnp.max(jnp.abs(weight)))
    w_scale, _ = symmetric_linear_quantization_params(num_bits_params, w_sat)
    w_q = linear_quantize_clamp(weight, w_scale, 0.0, params_min, params_max)
    b_q = linear_quantize_clamp(bias, in_scale * w_scale, 0.0, accum_min, accum_max)
    x_q = linear_quantize_clamp(x, in_scale, in_zp, acts_min, acts_max)
    accum = jnp.clip(x_q @ w_q.T + b_q, accum_min, accum_max)
    requant_scale = out_scale / (in_scale * w_scale)
    out_q = jnp.clip(jnp.round(requant_scale * accum - out_zp), acts_min, acts_max)
    return (out_q + out_zp) / out_scale


# TODO(synk): the base class is abstract (quantized_forward / qparam getters);
# only the static preset-stats, SYMMETRIC, ClipMode.NONE Linear instantiation is
# implemented. Dynamic (no-stats) calibration, asymmetric modes and ACIQ clipping
# are not translated.

if __name__ == "__main__":
    key = jax.random.PRNGKey(0)
    kx, kw, kb = jax.random.split(key, 3)

    B, In, Out = 16, 384, 256
    x = jax.random.uniform(kx, (B, In), jnp.float32, minval=-1.0, maxval=1.0)
    weight = jax.random.normal(kw, (Out, In), jnp.float32) * 0.1
    bias = jax.random.normal(kb, (Out,), jnp.float32) * 0.1

    in_stats = {'min': -1.0, 'max': 1.0}
    out_stats = {'min': -4.0, 'max': 4.0}

    # init-time parameter quantization (once)
    w_q_t, b_q, w_scale = quantize_linear_params(
        weight, bias, num_bits_acts=8, num_bits_params=8, num_bits_accum=32,
        in_stats=in_stats)

    # small tiles here to exercise the full (m, n, k) grid + accumulator path
    out = range_linear_quant_linear(
        x, w_q_t, b_q, w_scale=w_scale,
        in_stats=in_stats, out_stats=out_stats,
        tm=8, tn=128, tk=128)
    out = jax.block_until_ready(out)

    ref = _reference(x, weight, bias, in_stats, out_stats)
    assert out.shape == (B, Out)
    assert jnp.allclose(out, ref, atol=1e-5), "mismatch vs reference"
    print("KERNEL_OK")
</pallas_src>

<mosaic_0001>
module attributes {stable_mosaic.version = 11 : i64} {
  func.func @_rlq_linear_kernel(%arg0: i32, %arg1: i32, %arg2: i32, %arg3: memref<8x128xf32, #tpu.memory_space<vmem>>, %arg4: memref<128x128xbf16, #tpu.memory_space<vmem>>, %arg5: memref<1x128xf32, #tpu.memory_space<vmem>>, %arg6: memref<8x128xf32, #tpu.memory_space<vmem>>, %arg7: memref<8x128xf32, #tpu.memory_space<vmem>>) attributes {dimension_semantics = [#tpu.dimension_semantics<parallel>, #tpu.dimension_semantics<parallel>, #tpu.dimension_semantics<arbitrary>], iteration_bounds = array<i64: 2, 2, 3>, scalar_prefetch = 0 : i64, scratch_operands = 1 : i64, tpu.core_type = #tpu.core_type<tc>, window_params = [{transform_indices = @transform_0, window_bounds = array<i64: 8, 128>}, {transform_indices = @transform_1, window_bounds = array<i64: 128, 128>}, {transform_indices = @transform_2, window_bounds = array<i64: 1, 128>}, {transform_indices = @transform_3, window_bounds = array<i64: 8, 128>}]} {
    %c0_i32 = arith.constant 0 : i32
    %0 = arith.cmpi eq, %arg2, %c0_i32 : i32
    %1 = arith.extui %0 : i1 to i32
    %c0_i32_0 = arith.constant 0 : i32
    %2 = arith.cmpi ne, %1, %c0_i32_0 : i32
    scf.if %2 {
      %cst_12 = arith.constant 0.000000e+00 : f32
      %20 = vector.broadcast %cst_12 : f32 to vector<8x128xf32>
      %c0_13 = arith.constant 0 : index
      %c0_14 = arith.constant 0 : index
      %21 = vector.load %arg7[%c0_13, %c0_14] : memref<8x128xf32, #tpu.memory_space<vmem>>, vector<8x128xf32>
      tpu.vector_store %arg7[%c0_13, %c0_14], %20 {strides = array<i32>} : memref<8x128xf32, #tpu.memory_space<vmem>>, vector<8x128xf32>,
    } else {
    }
    %c0 = arith.constant 0 : index
    %c0_1 = arith.constant 0 : index
    %3 = vector.load %arg3[%c0, %c0_1] : memref<8x128xf32, #tpu.memory_space<vmem>>, vector<8x128xf32>
    %cst = arith.constant 1.270000e+02 : f32
    %4 = vector.broadcast %cst : f32 to vector<8x128xf32>
    %5 = arith.mulf %4, %3 : vector<8x128xf32>
    %6 = math.roundeven %5 : vector<8x128xf32>
    %cst_2 = arith.constant -1.280000e+02 : f32
    %cst_3 = arith.constant 1.270000e+02 : f32
    %7 = vector.broadcast %cst_2 : f32 to vector<8x128xf32>
    %8 = arith.maximumf %7, %6 : vector<8x128xf32>
    %9 = vector.broadcast %cst_3 : f32 to vector<8x128xf32>
    %10 = arith.minimumf %9, %8 : vector<8x128xf32>
    %c0_4 = arith.constant 0 : index
    %c0_5 = arith.constant 0 : index
    %11 = vector.load %arg7[%c0_4, %c0_5] : memref<8x128xf32, #tpu.memory_space<vmem>>, vector<8x128xf32>
    %12 = arith.truncf %10 : vector<8x128xf32> to vector<8x128xbf16>
    %c0_6 = arith.constant 0 : index
    %c0_7 = arith.constant 0 : index
    %13 = vector.load %arg4[%c0_6, %c0_7] : memref<128x128xbf16, #tpu.memory_space<vmem>>, vector<128x128xbf16>
    %cst_8 = arith.constant dense<0.000000e+00> : vector<8x128xf32>
    %14 = tpu.matmul %12, %13, %cst_8 {dimension_numbers = #tpu.dot_dimension_numbers<[1], [0], [0], [1], [0, 0, 1, 1], [], []>} : vector<8x128xbf16>, vector<128x128xbf16>, vector<8x128xf32> -> vector<8x128xf32>
    %15 = arith.addf %11, %14 : vector<8x128xf32>
    %c0_9 = arith.constant 0 : index
    %c0_10 = arith.constant 0 : index
    %16 = vector.load %arg7[%c0_9, %c0_10] : memref<8x128xf32, #tpu.memory_space<vmem>>, vector<8x128xf32>
    tpu.vector_store %arg7[%c0_9, %c0_10], %15 {strides = array<i32>} : memref<8x128xf32, #tpu.memory_space<vmem>>, vector<8x128xf32>,
    %c2_i32 = arith.constant 2 : i32
    %17 = arith.cmpi eq, %arg2, %c2_i32 : i32
    %18 = arith.extui %17 : i1 to i32
    %c0_i32_11 = arith.constant 0 : i32
    %19 = arith.cmpi ne, %18, %c0_i32_11 : i32
    scf.if %19 {
      %c0_12 = arith.constant 0 : index
      %c0_13 = arith.constant 0 : index
      %20 = vector.load %arg7[%c0_12, %c0_13] : memref<8x128xf32, #tpu.memory_space<vmem>>, vector<8x128xf32>
      %c0_14 = arith.constant 0 : index
      %c0_15 = arith.constant 0 : index
      %21 = vector.load %arg5[%c0_14, %c0_15] : memref<1x128xf32, #tpu.memory_space<vmem>>, vector<1x128xf32>
      %22 = vector.broadcast %21 : vector<1x128xf32> to vector<8x128xf32>
      %23 = arith.addf %20, %22 : vector<8x128xf32>
      %cst_16 = arith.constant -2.14748365E+9 : f32
      %cst_17 = arith.constant 2.14748365E+9 : f32
      %24 = vector.broadcast %cst_16 : f32 to vector<8x128xf32>
      %25 = arith.maximumf %24, %23 : vector<8x128xf32>
      %26 = vector.broadcast %cst_17 : f32 to vector<8x128xf32>
      %27 = arith.minimumf %26, %25 : vector<8x128xf32>
      %cst_18 = arith.constant 8.71274096E-4 : f32
      %28 = vector.broadcast %cst_18 : f32 to vector<8x128xf32>
      %29 = arith.mulf %28, %27 : vector<8x128xf32>
      %30 = math.roundeven %29 : vector<8x128xf32>
      %cst_19 = arith.constant -1.280000e+02 : f32
      %cst_20 = arith.constant 1.270000e+02 : f32
      %31 = vector.broadcast %cst_19 : f32 to vector<8x128xf32>
      %32 = arith.maximumf %31, %30 : vector<8x128xf32>
      %33 = vector.broadcast %cst_20 : f32 to vector<8x128xf32>
      %34 = arith.minimumf %33, %32 : vector<8x128xf32>
      %cst_21 = arith.constant 0.0314960629 : f32
      %35 = vector.broadcast %cst_21 : f32 to vector<8x128xf32>
      %36 = arith.mulf %34, %35 : vector<8x128xf32>
      %c0_22 = arith.constant 0 : index
      %c0_23 = arith.constant 0 : index
      %37 = vector.load %arg6[%c0_22, %c0_23] : memref<8x128xf32, #tpu.memory_space<vmem>>, vector<8x128xf32>
      tpu.vector_store %arg6[%c0_22, %c0_23], %36 {strides = array<i32>} : memref<8x128xf32, #tpu.memory_space<vmem>>, vector<8x128xf32>,
    } else {
    }
    return
  }
  func.func @transform_0(%arg0: i32, %arg1: i32, %arg2: i32) -> (i32, i32) {
    %c0_i32 = arith.constant 0 : i32
    return %arg0, %arg2 : i32, i32
  }
  func.func @transform_1(%arg0: i32, %arg1: i32, %arg2: i32) -> (i32, i32) {
    %c0_i32 = arith.constant 0 : i32
    return %arg2, %arg1 : i32, i32
  }
  func.func @transform_2(%arg0: i32, %arg1: i32, %arg2: i32) -> (i32, i32) {
    %c0_i32 = arith.constant 0 : i32
    %c0_i32_0 = arith.constant 0 : i32
    return %c0_i32, %arg1 : i32, i32
  }
  func.func @transform_3(%arg0: i32, %arg1: i32, %arg2: i32) -> (i32, i32) {
    %c0_i32 = arith.constant 0 : i32
    return %arg0, %arg1 : i32, i32
  }
}

</mosaic_0001>

<bundles_post_ra>
// kernel: tpu_custom_call.1
= control target key start
LH: loop header
LB: loop body
LE: loop exit
PB: predicated region body
PF: predicated region fallthrough
CT: control target
= control target key end

     0   :  { %s1376_s0 = inlined_call_operand.hbm [shape: f32[16,384], index: 0, kind: input, shape index: {}]   ;;  %s1377_s1 = inlined_call_operand.hbm [shape: bf16[384,256], index: 1, kind: input, shape index: {}]   ;;  %s1378_s2 = inlined_call_operand.vmem [shape: f32[1,256], index: 2, kind: input, shape index: {}]   ;;  %s1379_s3 = inlined_call_operand.hbm [shape: f32[16,256], index: 3, kind: output, shape index: {}]  }
   0x1   :  { %1393 = sst [smem:[#allocation25_spill]] %s1379_s3 }
   0x2   :  { %8 = vsyncpa [#allocation4], 0 }
   0x3   :  { %10 = vsyncpa [#allocation4 + $0x1], 0 }
   0x4   :  { %11 = vsyncpa [#allocation7], 0 }
   0x5   :  { %13 = vsyncpa [#allocation7 + $0x1], 0 }
   0x6   :  { %14 = vsyncpa [#allocation5], 0 }
   0x7   :  { %16 = vsyncpa [#allocation5 + $0x1], 0  ;;  %s1041_s12 = smov 0   ;;  %s1043_s13 = smov 0  }
   0x8   :  { %s1045_s14 = smov 0   ;;  %s1047_s15 = smov 0  }
   0x9   :  { %s1049_s16 = smov 0   ;;  %s1051_s17 = smov 0  }
   0xa   :  { %s1053_s18 = smov 0   ;;  %s1055_s19 = smov 0  }
   0xb   :  { %s1057_s20 = smov 0   ;;  %s1059_s21 = smov 0  }
   0xc   :  { %s1061_s22 = smov 0   ;;  %s1063_s23 = smov 0  }
   0xd   :  { %s1065_s24 = smov 0   ;;  %s1067_s25 = smov 0  }
   0xe   :  { %s1069_s26 = smov 0   ;;  %s1071_s27 = smov 0  }
   0xf LB: > { %1394 = sst [smem:[#allocation12_spill]] %s950_s12  ;;  %s1380_s28 = sadd.s32 4294967295, %s1010_s27   ;;  %s1010_s27 = sphi %s1071_s27, %s22_s27   ;;  %s1006_s26 = sphi %s1069_s26, %s1435_s26   ;;  %s1002_s25 = sphi %s1067_s25, %s1448_s25   ;;  %s998_s24 = sphi %s1065_s24, %s1447_s24   ;;  %s994_s23 = sphi %s1063_s23, %s1446_s23   ;;  %s990_s22 = sphi %s1061_s22, %s1445_s22   ;;  %s986_s21 = sphi %s1059_s21, %s1444_s21   ;;  %s982_s20 = sphi %s1057_s20, %s1431_s20   ;;  %s978_s19 = sphi %s1055_s19, %s1443_s19   ;;  %s974_s18 = sphi %s1053_s18, %s1442_s18   ;;  %s970_s17 = sphi %s1051_s17, %s1441_s17   ;;  %s966_s16 = sphi %s1049_s16, %s1440_s16   ;;  %s962_s15 = sphi %s1047_s15, %s1439_s15   ;;  %s958_s14 = sphi %s1045_s14, %s1428_s14   ;;  %s954_s13 = sphi %s1043_s13, %s1438_s13   ;;  %s950_s12 = sphi %s1041_s12, %s1436_s12  }
  0x10   : > { %1395 = sst [smem:[#allocation13_spill]] %s958_s14  ;;  %s34_s30 = sadd.s32 1, %s998_s24 }
  0x11   : > { %1396 = sst [smem:[#allocation14_spill]] %s982_s20  ;;  %s37_s4 = sadd.s32 1, %s1002_s25 }
  0x12   : > { %1397 = sst [smem:[#allocation15_spill]] %s994_s23  ;;  %p35_p0 = scmp.ge.s32.totalorder %s34_s30, 3 }
  0x13   : > { %1398 = sst [smem:[#allocation16_spill]] %s1006_s26  ;;  %s41_s5 = sadd.s32 1, %s1006_s26 }
  0x14   : > { %s50_s6 = sadd.s32 1, %s982_s20  ;;  %p57_p1 = scmp.ne.s32.totalorder %s982_s20, %s978_s19 }
  0x15   : > { %s1450_s30 = smov (%p35_p0, %s34_s30), 0  ;;  %s1452_s4 = smov (!%p35_p0, %s37_s4), %s1002_s25 }
  0x16   : > { %1399 = sst [smem:[#allocation17_spill]] %s1450_s30  ;;  %s46_s7 = ssub.s32 %s998_s24, %s1450_s30 }
  0x17   : > { %p58_p2 = scmp.eq.s32.totalorder %s1010_s27, 0  ;;  %p39_p3 = scmp.ge.s32.totalorder %s1452_s4, 2 }
  0x18   : > { %p63_p4 = scmp.ne.s32.totalorder %s978_s19, %s974_s18  ;;  %p1142_p6 = scmp.eq.s32.totalorder %s1380_s28, 0 }
  0x19   : > { %p1136_p5 = por %p58_p2, %p57_p1  ;;  %s1454_s4 = smov (%p39_p3, %s1452_s4), 0 }
  0x1a   : > { %1402 = sst [smem:[#allocation18_spill]] %s1454_s4  ;;  %s1456_s5 = smov (!%p39_p3, %s41_s5), %s1006_s26 }
  0x1b   : > { %p1151_p7 = por %p1142_p6, %p63_p4  ;;  %s74_s11 = ssub.s32 %s1002_s25, %s1454_s4 }
  0x1c   : > { %p43_p8 = scmp.ge.s32.totalorder %s1456_s5, 2  ;;  %s75_s18 = sor.u32 %s74_s11, %s46_s7 }
  0x1d   : > { %p76_p9 = scmp.eq.s32.totalorder %s75_s18, 0  ;;  %s78_s29 = sadd.s32 1, %s970_s17 }
  0x1e   : > { %s1458_s5 = smov (%p43_p8, %s1456_s5), 0  ;;  %p85_p10 = scmp.ne.s32.totalorder %s970_s17, %s966_s16 }
  0x1f   : > { %1404 = sst [smem:[#allocation19_spill]] %s1458_s5  ;;  %s45_s30 = ssub.s32 %s1006_s26, %s1458_s5 }
  0x20   : > { %s1161_s28 = scalar_select %p76_p9, %s970_s17, %s78_s29  }
  0x21   : > { %s47_s4 = sor.u32 %s46_s7, %s45_s30  ;;  %p91_p11 = scmp.ne.s32.totalorder %s966_s16, %s962_s15 }
  0x22   : > { %1405 = sst [smem:[#allocation20_spill]] %s1161_s28  ;;  %p48_p12 = scmp.eq.s32.totalorder %s47_s4, 0 }
  0x23   : > { %p1171_p13 = por %p85_p10, %p58_p2  ;;  %p1177_p0 = por %p91_p11, %p1142_p6 }
  0x24   : > { %s129_s5 = sor.u32 %s74_s11, %s45_s30  ;;  %s132_s15 = sadd.s32 1, %s958_s14 }
  0x25   : > { %s1182_s28 = scalar_select %p48_p12, %s982_s20, %s50_s6  }
  0x26   : > { %p130_p1 = scmp.eq.s32.totalorder %s129_s5, 0  ;;  %p142_p3 = scmp.ne.s32.totalorder %s958_s14, %s954_s13 }
  0x27   : > { %1408 = sst [smem:[#allocation21_spill]] %s1182_s28  ;;  %s1409_s4 = sadd.s32 4294967295, %s1010_s27  }
  0x28   : > { %p143_p2 = scmp.eq.s32.totalorder %s1409_s4, 11  ;;  %p148_p6 = scmp.ne.s32.totalorder %s954_s13, %s950_s12 }
  0x29   : > { %s1190_s7 = scalar_select %p130_p1, %s958_s14, %s132_s15  }
  0x2a   : > { %p1192_p4 = por %p143_p2, %p142_p3  ;;  %s1413_s3 = sadd.s32 4294967294, %s1010_s27  }
  0x2b   : > { %1410 = sst [smem:[#allocation22_spill]] %s1190_s7  ;;  %p149_p8 = scmp.eq.s32.totalorder %s1413_s3, 11 }
  0x2c   : > { %s1411_s9 = scalar_select %p1192_p4, 1, 0 }
  0x2d   : > { %p1392_p9 = scmp.lt.s32.totalorder %s1010_s27, 12  ;;  %s169_s23 = sand.u32 1, %s982_s20  }
  0x2e   : > { %1412 = sst [smem:[#allocation23_spill]] %s1411_s9  ;;  %p1202_p10 = por %p149_p8, %p148_p6 }
  0x2f   : > { %s555_s5 = sshll.u32 %s169_s23, 3  ;;  %s612_s6 = smul.u32 3, %s1006_s26 }
  0x30   : > { %s1414_s30 = scalar_select %p1202_p10, 1, 0 }
  0x31   : > { %p1211_p11 = pnand %p1392_p9, %p1136_p5  ;;  %s178_s15 = sadd.s32 %s998_s24, %s612_s6 }
  0x32   : > { %1415 = sst [smem:[#allocation24_spill]] %s1414_s30  ;;  %s173_s4 = scalar_lea.vmem [#allocation3], %s555_s5 }
  0x33   : > { %s182_s28 = sshll.u32 %s173_s4, 4  ;;  %s556_s7 = sshll.u32 %s178_s15, 7  ;;  %s183_s28 = int_to_ptr.vmem [resolvable:$true] %s182_s28 }
  0x34   : > { %s180_s14 = scalar_lea.hbm %s1376_s0, %s556_s7  ;;  %s170_s12 = scalar_lea.sflag [#allocation4], %s169_s23 }
  0x35   : > { %p792_p12 = pneg %p1211_p11  ;;  %s803_s26 = scalar_lea.vmem %s183_s28, 128 }
  0x36   : > { %p804_p1 = scmp.ne.s32.totalorder %s183_s28, %s803_s26  ;;  %s1012_s8 = smov [#allocation3]  }
  0x37   : > { %s808_s30 = sshll.u32 %s1012_s8, 4  ;;  %s809_s30 = int_to_ptr.vmem [resolvable:$false] %s808_s30 }
  0x38   : > { %p806_p3 = pnand %p804_p1, %p792_p12  ;;  %s810_s9 = scalar_lea.vmem %s809_s30, 256 }
  0x39   : > { %p811_p2 = scmp.lt.s32.totalorder %s183_s28, %s809_s30  ;;  %p812_p6 = scmp.lt.s32.totalorder %s810_s9, %s803_s26 }
  0x3a   : > { %p807_p5 = pneg %p806_p3 }
  0x3b   : > { %p813_p8 = por %p812_p6, %p811_p2 }
  0x3d   : > { %p814_p9 = pnand %p813_p8, %p807_p5 }
  0x3f   : > { %817 = shalt.err (!%p814_p9)
}
  0x40   : > { %638 = dma.hbm_to_vmem [thread:$0]  (!%p1211_p11), %s180_s14, 128, %s183_s28, %s170_s12  }
  0x41   : > { %s582_s20 = sshll.u32 %s998_s24, 5  ;;  %p1417_p12 = scmp.lt.s32.totalorder %s1010_s27, 12 }
  0x42   : > { %p561_p3 = scmp.ge.s32.totalorder %s1010_s27, 1  ;;  %p216_p9 = scmp.lt.s32.totalorder %s1010_s27, 13 }
  0x43   : > { %p1228_p1 = pnand %p1417_p12, %p1171_p13  ;;  %s189_s26 = sand.u32 1, %s970_s17  }
  0x44   : > { %p1235_p5 = pnand %p561_p3, %p216_p9  ;;  %s557_s9 = sshll.u32 %s189_s26, 6 }
  0x45   : > { %s199_s30 = sadd.s32 %s1002_s25, %s582_s20  ;;  %s193_s28 = scalar_lea.vmem [#allocation6], %s557_s9 }
  0x46   : > { %s560_s5 = sshll.u32 %s199_s30, 6  ;;  %s202_s18 = sshll.u32 %s193_s28, 4  ;;  %s203_s18 = int_to_ptr.vmem [resolvable:$true] %s202_s18 }
  0x47   : > { %s201_s14 = scalar_lea.hbm %s1377_s1, %s560_s5  ;;  %s190_s11 = scalar_lea.sflag [#allocation7], %s189_s26 }
  0x48   : > { %p820_p13 = pneg %p1228_p1  ;;  %s831_s15 = scalar_lea.vmem %s203_s18, 1024 }
  0x49   : > { %p832_p11 = scmp.ne.s32.totalorder %s203_s18, %s831_s15  ;;  %s1013_s4 = smov [#allocation6]  }
  0x4a   : > { %s836_s3 = sshll.u32 %s1013_s4, 4  ;;  %s837_s3 = int_to_ptr.vmem [resolvable:$false] %s836_s3 }
  0x4b   : > { %p834_p2 = pnand %p832_p11, %p820_p13  ;;  %s838_s8 = scalar_lea.vmem %s837_s3, 2048 }
  0x4c   : > { %p839_p8 = scmp.lt.s32.totalorder %s203_s18, %s837_s3  ;;  %p840_p12 = scmp.lt.s32.totalorder %s838_s8, %s831_s15 }
  0x4d   : > { %p835_p6 = pneg %p834_p2 }
  0x4e   : > { %p841_p3 = por %p840_p12, %p839_p8 }
  0x50   : > { %p842_p9 = pnand %p841_p3, %p835_p6 }
  0x52   : > { %845 = shalt.err (!%p842_p9)
}
  0x53   : > { %s1014_s20 = smov 128   ;;  %s1015_s9 = smov 64  }
  0x54   : > { %s1016_s30 = smov 4   ;;  %220 = sbr.rel (%p1235_p5) target bundleno = 387 (0x183), region = 32 }
  0x55   : > { %641 = dma.hbm_to_vmem [thread:$0]  (!%p1228_p1), %s201_s14, 1024, %s203_s18, %s190_s11, %s1014_s20, %s1015_s9, %s1016_s30  }
  0x56   : > { %s222_s26 = sand.u32 (!%p1235_p5), 1, %s978_s19  }
  0x57   : > { %s1250_s5 = sshll.u32 (!%p1235_p5), %s222_s26, 3  ;;  %s223_s6 = scalar_lea.sflag (!%p1235_p5), [#allocation4], %s222_s26 }
  0x58   : > { %s226_s12 = scalar_lea.vmem (!%p1235_p5), [#allocation3], %s1250_s5 }
  0x59   : > { %937 = dma.done.wait (%p1151_p7), %s223_s6, 128  }
  0x5a   : > { %939 = vsyncadd (%p1151_p7), %s223_s6, 4294967168  ;;  %s231_s23 = sand.u32 1, %s966_s16  }
  0x5b   : > { %s563_s14 = sshll.u32 %s231_s23, 6  ;;  %s232_s28 = scalar_lea.sflag [#allocation7], %s231_s23 }
  0x5c   : > { %s1258_s7 = scalar_lea.vmem [#allocation6], %s563_s14 }
  0x5d   : > { %941 = dma.done.wait (%p1177_p0), %s232_s28, 1024  }
  0x5e   : > { %943 = vsyncadd (%p1177_p0), %s232_s28, 4294966272  ;;  %s263_s18 = sand.u32 1, %s954_s13   ;;  %p267_p1 = scmp.lt.s32.totalorder %s990_s22, 1 }
  0x5f   : > { %s1268_s10 = sshll.u32 %s263_s18, 3  ;;  %p565_p7 = scmp.ne.s32.totalorder %s986_s21, 0 }
  0x60   : > { %s1271_s11 = scalar_select %p267_p1, %s990_s22, 1 }
  0x61   : > { %s265_s8 = scalar_lea.vmem [#allocation8], %s1268_s10  ;;  %274 = sbr.rel (%p565_p7) target bundleno = 104 (0x68), region = 44 }
  0x62   : > { %s269_s3 = scalar_lea.vmem %s1378_s2, %s1271_s11 }
  0x66   : > { %v1017_v0 = vmov 0.0  }
  0x67   : > { %275 = vst [vmem:[#allocation2] sm:$0xff] %v1017_v0 }
  0x68 PF: > { %v782_v1 = vld [vmem:[%s1258_s7 + $0x38] sm:$0xff]   ;;  %v1018_v2 = vmov 0.0   ;;  %v783_v3 = vld [vmem:[%s1258_s7 + $0x30] sm:$0xff]   ;;  %vm1019_vm0 = vmmov 0   ;;  %v784_v4 = vld [vmem:[%s1258_s7 + $0x28] sm:$0xff]   ;;  %p574_p0 = scmp.ne.s32.totalorder %s986_s21, 2 }
  0x69   : > { %592 = vmatprep.subr.bf16.mxu0 %v1018_v2  ;;  %608 = vmatprep.mubr.msk.bf16.mxu0 %vm1019_vm0, %v1018_v2  ;;  %v276_v5 = vld [vmem:[%s226_s12] sm:$0xff]  ;;  %v785_v7 = vld [vmem:[%s1258_s7 + $0x20] sm:$0xff]   ;;  %v788_v18 = vld [vmem:[%s1258_s7 + $0x8] sm:$0xff]  }
  0x6a   : > { %593 = vmatpush3.bf16.msra.mxu0 %v782_v1  ;;  %v277_v6 = vmul.f32 127.0, %v276_v5  ;;  %v786_v12 = vld [vmem:[%s1258_s7 + $0x18] sm:$0xff]   ;;  %v787_v15 = vld [vmem:[%s1258_s7 + $0x10] sm:$0xff]   ;;  %v789_v20 = vld [vmem:[%s1258_s7] sm:$0xff]  }
  0x6b   : > { %594 = vmatprep.subr.bf16.mxu0 %v1018_v2 }
  0x6c   : > { %v615_v8 = vcvt.f32.s32 %v277_v6  ;;  %v613_v9 = vand.u32 2147483647, %v277_v6  ;;  %v618_v11 = vand.u32 2147483648, %v277_v6 }
  0x6e   : > { %595 = vmatpush3.bf16.msra.mxu0 %v783_v3  ;;  %v616_v10 = vcvt.s32.f32 %v615_v8  ;;  %vm614_vm1 = vcmp.lt.f32.partialorder %v613_v9, 8388608.0  ;;  %v281_v22 = vld [vmem:[#allocation2] sm:$0xff] }
  0x6f   : > { %596 = vmatprep.subr.bf16.mxu0 %v1018_v2 }
  0x70   : > { %v617_v13 = vand.u32 2147483647, %v616_v10 }
  0x72   : > { %597 = vmatpush3.bf16.msra.mxu0 %v784_v4  ;;  %v619_v14 = vor.u32 %v618_v11, %v617_v13 }
  0x73   : > { %598 = vmatprep.subr.bf16.mxu0 %v1018_v2 }
  0x74   : > { %v620_v16 = vsel %vm614_vm1, %v619_v14, %v277_v6 }
  0x75   : > { %v279_v17 = vmax.f32 %v620_v16, -128.0 }
  0x76   : > { %599 = vmatpush3.bf16.msra.mxu0 %v785_v7 }
  0x77   : > { %600 = vmatprep.subr.bf16.mxu0 %v1018_v2  ;;  %v280_v19 = vmin.f32 %v279_v17, 127.0 }
  0x79   : > { %v282_v21 = vpack.c.bf16 %v280_v19, %v280_v19 }
  0x7a   : > { %601 = vmatpush3.bf16.msra.mxu0 %v786_v12 }
  0x7b   : > { %602 = vmatprep.subr.bf16.mxu0 %v1018_v2 }
  0x7e   : > { %603 = vmatpush3.bf16.msra.mxu0 %v787_v15 }
  0x7f   : > { %604 = vmatprep.subr.bf16.mxu0 %v1018_v2 }
  0x82   : > { %605 = vmatpush3.bf16.msra.mxu0 %v788_v18 }
  0x83   : > { %606 = vmatprep.subr.bf16.mxu0 %v1018_v2 }
  0x86   : > { %607 = vmatpush3.bf16.msra.mxu0 %v789_v20 }
  0x89   : > { %609 = vmatmul.mubr.bf16.vlgmr.msra.gmra.mxu0 %v282_v21 }
 0x149   : > { %v381_v23 = vpop.f32.mrf.mxu0 }
 0x14a   : > { %v387_v24 = vadd.f32 %v381_v23, %v281_v22 }
 0x14b   : > { %v610_v25 = vpop.f32.mrf.mxu0  ;;  %392 = sbr.rel (%p574_p0) target bundleno = 362 (0x16a), region = 48 }
 0x14c   : > { %388 = vst [vmem:[#allocation2] sm:$0xff] %v387_v24 }
 0x14d   : > { %v384_v26 = vpop.f32.mrf.mxu0 }
 0x14f   : > { %v611_v27 = vpop.f32.mrf.mxu0 }
 0x150   : > { %v575_v29 = vld [vmem:[%s269_s3] ss:$0 sm:$0xff] }
 0x153   : > { %v393_v28 = vld [vmem:[#allocation2] sm:$0xff] }
 0x154   : > { %v401_v30 = vadd.f32 %v575_v29, %v393_v28 }
 0x156   : > { %v576_v31 = vclamps-f32 %v401_v30, 2.1474836e+09 }
 0x158   : > { %v404_v32 = vmul.f32 0.0008712741, %v576_v31 }
 0x15a   : > { %v623_v33 = vcvt.f32.s32 %v404_v32  ;;  %v621_v34 = vand.u32 2147483647, %v404_v32  ;;  %v626_v36 = vand.u32 2147483648, %v404_v32 }
 0x15c   : > { %v624_v35 = vcvt.s32.f32 %v623_v33  ;;  %vm622_vm2 = vcmp.lt.f32.partialorder %v621_v34, 8388608.0 }
 0x15e   : > { %v625_v37 = vand.u32 2147483647, %v624_v35 }
 0x160   : > { %v627_v38 = vor.u32 %v626_v36, %v625_v37 }
 0x162   : > { %v628_v39 = vsel %vm622_vm2, %v627_v38, %v404_v32 }
 0x163   : > { %v406_v40 = vmax.f32 %v628_v39, -128.0 }
 0x165   : > { %v407_v41 = vmin.f32 %v406_v40, 127.0 }
 0x167   : > { %v408_v42 = vmul.f32 0.031496063, %v407_v41 }
 0x169   : > { %409 = vst [vmem:[%s265_s8] sm:$0xff] %v408_v42 }
 0x16a PF: > { %s1420_s21 = sld [smem:[#allocation15_spill]]  ;;  %s426_s5 = sshll.u32 %s265_s8, 4  ;;  %s427_s5 = int_to_ptr.vmem [resolvable:$true] %s426_s5 }
 0x16b   : > { %s1422_s14 = sld [smem:[#allocation25_spill]]  ;;  %s411_s11 = scalar_lea.sflag [#allocation5], %s263_s18 }
 0x16c   : > { %s846_s15 = scalar_lea.vmem %s427_s5, 128  ;;  %s1020_s4 = smov [#allocation8]  }
 0x16d   : > { %p847_p5 = scmp.ne.s32.totalorder %s427_s5, %s846_s15  ;;  %s850_s3 = sshll.u32 %s1020_s4, 4  ;;  %s851_s3 = int_to_ptr.vmem [resolvable:$false] %s850_s3 }
 0x16e   : > { %s852_s29 = scalar_lea.vmem %s851_s3, 256  ;;  %p853_p2 = scmp.lt.s32.totalorder %s427_s5, %s851_s3 }
 0x16f   : > { %p848_p13 = pnand %p847_p5, %p1192_p4  ;;  %p854_p6 = scmp.lt.s32.totalorder %s852_s29, %s846_s15 }
 0x170   : > { %s578_s30 = sshll.u32 %s1420_s21, 1 }
 0x171   : > { %s422_s26 = sadd.s32 %s990_s22, %s578_s30  ;;  %s1423_s28 = smov %s1422_s14 }
 0x172   : > { %s579_s6 = sshll.u32 %s422_s26, 7  ;;  %p849_p11 = pneg %p848_p13 }
 0x173   : > { %s424_s7 = scalar_lea.hbm %s1422_s14, %s579_s6  ;;  %p855_p8 = por %p854_p6, %p853_p2 }
 0x175   : > { %p856_p12 = pnand %p855_p8, %p849_p11 }
 0x177   : > { %859 = shalt.err (!%p856_p12)
}
 0x178   : > { %s860_s22 = scalar_lea.hbm %s424_s7, 128  ;;  %s864_s8 = scalar_lea.hbm %s1423_s28, 512 }
 0x179   : > { %p861_p3 = scmp.ne.s32.totalorder %s424_s7, %s860_s22  ;;  %p865_p7 = scmp.lt.s32.totalorder %s424_s7, %s1423_s28 }
 0x17a   : > { %p866_p0 = scmp.lt.s32.totalorder %s864_s8, %s860_s22 }
 0x17b   : > { %p862_p9 = pnand %p861_p3, %p1192_p4 }
 0x17c   : > { %p867_p5 = por %p866_p0, %p865_p7 }
 0x17d   : > { %p863_p1 = pneg %p862_p9 }
 0x17f   : > { %p868_p13 = pnand %p867_p5, %p863_p1 }
 0x181   : > { %871 = shalt.err (!%p868_p13)
}
 0x182   : > { %633 = dma.vmem_to_hbm [thread:$0]  (%p1192_p4), %s427_s5, 128, %s424_s7, %s411_s11  }
 0x183 PF: > { %s1424_s30 = sld [smem:[#allocation12_spill]]  ;;  %p647_p11 = scmp.ge.s32.totalorder %s1010_s27, 2 }
 0x185   : > { %p643_p2 = pnand %p647_p11, %p1202_p10 }
 0x187   : > { %p644_p6 = pneg %p643_p2 }
 0x189   : > { %s438_s6 = sand.u32 1, %s1424_s30  }
 0x18a   : > { %s439_s12 = scalar_lea.sflag [#allocation5], %s438_s6 }
 0x18b   : > { %945 = dma.done.wait (%p644_p6), %s439_s12, 128  }
 0x18c   : > { %947 = vsyncadd (%p644_p6), %s439_s12, 4294967168  ;;  %s22_s27 = sadd.s32 1, %s1010_s27   ;;  %s1427_s9 = sld [smem:[#allocation13_spill]] }
 0x18d   : > { %p1323_p8 = scmp.ge.s32.totalorder %s22_s27, 14   ;;  %s1428_s14 = sld [smem:[#allocation22_spill]] }
 0x18e   : > { %s1429_s5 = sld [smem:[#allocation20_spill]]  ;;  %s1436_s12 = smov %s954_s13 }
 0x18f   : > { %s1430_s7 = sld [smem:[#allocation14_spill]]  ;;  %s1439_s15 = smov %s966_s16 }
 0x190   : > { %s1431_s20 = sld [smem:[#allocation21_spill]]  ;;  %s1440_s16 = smov %s970_s17 }
 0x191   : > { %s1432_s11 = sld [smem:[#allocation16_spill]]  ;;  %s1442_s18 = smov %s978_s19 }
 0x192   : > { %s1433_s4 = sld [smem:[#allocation17_spill]]  ;;  %s1438_s13 = smov %s1427_s9 }
 0x193   : > { %s1434_s3 = sld [smem:[#allocation18_spill]]  ;;  %s1444_s21 = smov %s998_s24 }
 0x194   : > { %s1435_s26 = sld [smem:[#allocation19_spill]]  ;;  %s1441_s17 = smov %s1429_s5 }
 0x195   : > { %s1443_s19 = smov %s1430_s7  ;;  %s1445_s22 = smov %s1002_s25 }
 0x196   :  { %21 = sbr.rel (!%p1323_p8) target bundleno = 15 (0xf), region = 101 }
 0x197   : > { %s1446_s23 = smov %s1432_s11 }
 0x198   : > { %s1447_s24 = smov %s1433_s4 }
 0x199   : > { %s1448_s25 = smov %s1434_s3 }
 0x19b   :  { %444 = vsyncpa [#allocation4], 1 }
 0x19c   :  { %446 = vsyncpa [#allocation4 + $0x1], 1 }
 0x19d   :  { %447 = vsyncpa [#allocation7], 1 }
 0x19e   :  { %449 = vsyncpa [#allocation7 + $0x1], 1 }
 0x19f   :  { %450 = vsyncpa [#allocation5], 1 }
 0x1a0   :  { %452 = vsyncpa [#allocation5 + $0x1], 1 }

</bundles_post_ra>
